<compile_context>
chip_gen: v7x
topology: tpu7x:2x2x1
jax: 0.10.0
libtpu: 0.0.40
codegen_flags: <defaults>
</compile_context>

<pallas_src>
import functools

import jax
import jax.numpy as jnp
from jax import lax
from jax.experimental import pallas as pl
from jax.experimental.pallas import tpu as pltpu


def _seq2seq_kernel(x_ref, w_ref, b_ref, tok_ref, mask_ref, *,
                    src_pad_idx, use_bf16_matmul):
    # x_ref   : [TB, F] float32   (batch tile in sublanes, features in lanes)
    # w_ref   : [L, F]  float32   (original nn.Linear weight layout, NOT transposed)
    # b_ref   : [1, L]  float32
    # tok_ref : [TB, L] int32     (token ids in [0, 255])
    # mask_ref: [TB, L] int8      (1 where token != src_pad_idx)
    x = x_ref[...]
    w = w_ref[...]
    b = b_ref[...]

    if use_bf16_matmul:
        # Optional (v6e/v7x): halves the weight stream from HBM and hits the
        # native bf16 MXU rate. NOT bit-exact vs the f32 torch path.
        x = x.astype(jnp.bfloat16)
        w = w.astype(jnp.bfloat16)

    # x @ W.T + b : contract the feature axes directly so the MXU consumes the
    # [L, F] weight as-is (no separate transpose op / extra O(F*L) HBM copy).
    y = lax.dot_general(
        x, w,
        dimension_numbers=(((1,), (1,)), ((), ())),
        preferred_element_type=jnp.float32,
    ) + b

    # Row-wise min-max normalization to [0, 255], same order as the torch
    # in-place ops (subtract min, then scale by max of the shifted values).
    y = y - jnp.min(y, axis=1, keepdims=True)
    # NOTE: if a row of y is constant, row_max == 0 and the scale is inf/NaN;
    # the torch module has the same divide-by-zero precondition.
    row_max = jnp.max(y, axis=1, keepdims=True)
    # One tile-wide vmul; the per-row exact reciprocal is a tiny [TB, 1] op.
    # (Differs from "divide then *255" by <= 1 ulp before the truncation.)
    scale = 255.0 * pl.reciprocal(row_max, approx=False)
    y = y * scale

    # torch .type(LongTensor) truncates toward zero; values are in [0, 255] by
    # construction, so int32 is safe here (torch uses int64) — revisit if the
    # 255 scale ever changes.
    tok = y.astype(jnp.int32)
    tok_ref[...] = tok
    mask_ref[...] = (tok != src_pad_idx).astype(jnp.int8)


def seq2seq_forward(src, weight, bias, src_pad_idx, *,
                    block_b=256, use_bf16_matmul=False):
    """src: [B, F] f32; weight: [L, F] (nn.Linear layout); bias: [L].

    Returns (tokens [B, L] int32, src_mask [B, 1, 1, L] bool).
    """
    B, F = src.shape
    L, F2 = weight.shape
    assert F == F2, "weight must be [max_len, feature_shape_size]"

    # Batch tiling: keep L (= max_len) whole and lane-dense; tile the batch on
    # the 8-sublane (f32) grain so stores stay unmasked and the grid axis can
    # be sharded across TensorCores. Tiny batches use one full-array block
    # (block_shape == array dims waives the (8,128) divisibility rule).
    if B >= 8:
        tb = max(8, (min(block_b, B) // 8) * 8)
        num_blocks = pl.cdiv(B, tb)
        Bp = num_blocks * tb
    else:
        tb, num_blocks, Bp = B, 1, B

    src_p = src if Bp == B else jnp.pad(src, ((0, Bp - B), (0, 0)))

    kernel = functools.partial(
        _seq2seq_kernel,
        src_pad_idx=src_pad_idx,
        use_bf16_matmul=use_bf16_matmul,
    )

    tok_p, mask_p = pl.pallas_call(
        kernel,
        out_shape=(
            jax.ShapeDtypeStruct((Bp, L), jnp.int32),
            jax.ShapeDtypeStruct((Bp, L), jnp.int8),
        ),
        grid=(num_blocks,),
        in_specs=[
            pl.BlockSpec((tb, F), lambda i: (i, 0)),   # src batch tile
            pl.BlockSpec((L, F), lambda i: (0, 0)),    # weight (resident)
            pl.BlockSpec((1, L), lambda i: (0, 0)),    # bias   (resident)
        ],
        out_specs=(
            pl.BlockSpec((tb, L), lambda i: (i, 0)),   # tokens
            pl.BlockSpec((tb, L), lambda i: (i, 0)),   # mask (int8)
        ),
        compiler_params=pltpu.CompilerParams(
            dimension_semantics=("parallel",),
            # Resident [L, F] weight + double-buffered src/tok/mask tiles fit
            # easily at these shapes; 32 MiB is safe on v5e/v6e/v7x. For very
            # large F*L, add a reduction grid axis over F (last, "arbitrary")
            # with an f32 accumulator scratch instead of loading all of F.
            vmem_limit_bytes=32 * 1024 * 1024,
        ),
    )(src_p, weight, bias.reshape(1, L))

    tok = tok_p[:B] if Bp != B else tok_p
    mask = mask_p[:B] if Bp != B else mask_p

    # make_src_mask: bool [B, 1, 1, L]. The int8->bool cast and the unit-dim
    # broadcast are cheap metadata ops; the 4x-smaller int8 writeback already
    # happened in the kernel.
    src_mask = (mask != 0)[:, None, None, :]
    return tok, src_mask


def seq2seq_reference(src, weight, bias, src_pad_idx):
    """Pure-JAX reference. Mirrors the kernel's fused 255/max scale, which
    matches the torch module up to <= 1 ulp before the integer truncation."""
    y = lax.dot_general(src, weight, (((1,), (1,)), ((), ())),
                        preferred_element_type=jnp.float32) + bias
    y = y - jnp.min(y, axis=1, keepdims=True)
    inv = 1.0 / jnp.max(y, axis=1, keepdims=True)
    tok = (y * (255.0 * inv)).astype(jnp.int32)
    mask = (tok != src_pad_idx)[:, None, None, :]
    return tok, mask


if __name__ == "__main__":
    # Small shapes consistent with the module's forward:
    #   batch B = 2, feature_shape_size F = 64, max_len L = 128
    B, F, L = 2, 64, 128
    SRC_PAD_IDX = 0

    key = jax.random.PRNGKey(0)
    kx, kw, kb = jax.random.split(key, 3)

    src = jax.random.normal(kx, (B, F), dtype=jnp.float32)

    # Deterministic nn.Linear-style init: U(-1/sqrt(F), 1/sqrt(F)); weight kept
    # in the original [max_len, feature] layout (no pre-transpose anywhere).
    bound = 1.0 / (F ** 0.5)
    weight = jax.random.uniform(kw, (L, F), jnp.float32, -bound, bound)
    bias = jax.random.uniform(kb, (L,), jnp.float32, -bound, bound)

    tok, src_mask = seq2seq_forward(src, weight, bias, SRC_PAD_IDX)
    tok = jax.block_until_ready(tok)
    src_mask = jax.block_until_ready(src_mask)

    ref_tok, ref_mask = seq2seq_reference(src, weight, bias, SRC_PAD_IDX)

    assert tok.shape == (B, L) and tok.dtype == jnp.int32
    assert src_mask.shape == (B, 1, 1, L) and src_mask.dtype == jnp.bool_
    assert jnp.array_equal(tok, ref_tok), "token mismatch vs reference"
    assert jnp.array_equal(src_mask, ref_mask), "mask mismatch vs reference"

    print("KERNEL_OK")
</pallas_src>

<mosaic_0001>
module attributes {stable_mosaic.version = 11 : i64} {
  func.func @_seq2seq_kernel(%arg0: i32, %arg1: memref<2x64xf32, #tpu.memory_space<vmem>>, %arg2: memref<128x64xf32, #tpu.memory_space<vmem>>, %arg3: memref<1x128xf32, #tpu.memory_space<vmem>>, %arg4: memref<2x128xi32, #tpu.memory_space<vmem>>, %arg5: memref<2x128xi8, #tpu.memory_space<vmem>>) attributes {dimension_semantics = [#tpu.dimension_semantics<parallel>], iteration_bounds = array<i64: 1>, scalar_prefetch = 0 : i64, scratch_operands = 0 : i64, tpu.core_type = #tpu.core_type<tc>, window_params = [{transform_indices = @transform_0, window_bounds = array<i64: 2, 64>}, {pipeline_mode = #tpu.pipeline_mode<synchronous>, transform_indices = @transform_1, window_bounds = array<i64: 128, 64>}, {pipeline_mode = #tpu.pipeline_mode<synchronous>, transform_indices = @transform_2, window_bounds = array<i64: 1, 128>}, {transform_indices = @transform_3, window_bounds = array<i64: 2, 128>}, {transform_indices = @transform_4, window_bounds = array<i64: 2, 128>}]} {
    %c0 = arith.constant 0 : index
    %c0_0 = arith.constant 0 : index
    %0 = vector.load %arg1[%c0, %c0_0] : memref<2x64xf32, #tpu.memory_space<vmem>>, vector<2x64xf32>
    %c0_1 = arith.constant 0 : index
    %c0_2 = arith.constant 0 : index
    %1 = vector.load %arg2[%c0_1, %c0_2] : memref<128x64xf32, #tpu.memory_space<vmem>>, vector<128x64xf32>
    %c0_3 = arith.constant 0 : index
    %c0_4 = arith.constant 0 : index
    %2 = vector.load %arg3[%c0_3, %c0_4] : memref<1x128xf32, #tpu.memory_space<vmem>>, vector<1x128xf32>
    %cst = arith.constant dense<0.000000e+00> : vector<2x128xf32>
    %3 = tpu.matmul %0, %1, %cst {dimension_numbers = #tpu.dot_dimension_numbers<[1], [1], [0], [0], [0, 0, 1, 0], [], []>} : vector<2x64xf32>, vector<128x64xf32>, vector<2x128xf32> -> vector<2x128xf32>
    %4 = vector.broadcast %2 : vector<1x128xf32> to vector<2x128xf32>
    %5 = arith.addf %3, %4 : vector<2x128xf32>
    %cst_5 = arith.constant dense<0x7F800000> : vector<2xf32>
    %6 = vector.multi_reduction <minimumf>, %5, %cst_5 [1] : vector<2x128xf32> to vector<2xf32>
    %7 = vector.shape_cast %6 : vector<2xf32> to vector<2x1xf32>
    %8 = vector.broadcast %7 : vector<2x1xf32> to vector<2x128xf32>
    %9 = arith.subf %5, %8 : vector<2x128xf32>
    %cst_6 = arith.constant dense<0xFF800000> : vector<2xf32>
    %10 = vector.multi_reduction <maximumf>, %9, %cst_6 [1] : vector<2x128xf32> to vector<2xf32>
    %11 = vector.shape_cast %10 : vector<2xf32> to vector<2x1xf32>
    %12 = tpu.reciprocal %11 : vector<2x1xf32> -> vector<2x1xf32>
    %cst_7 = arith.constant 2.550000e+02 : f32
    %13 = vector.broadcast %cst_7 : f32 to vector<2x1xf32>
    %14 = arith.mulf %13, %12 : vector<2x1xf32>
    %15 = vector.broadcast %14 : vector<2x1xf32> to vector<2x128xf32>
    %16 = arith.mulf %9, %15 : vector<2x128xf32>
    %17 = arith.fptosi %16 : vector<2x128xf32> to vector<2x128xi32>
    %c0_8 = arith.constant 0 : index
    %c0_9 = arith.constant 0 : index
    %18 = vector.load %arg4[%c0_8, %c0_9] : memref<2x128xi32, #tpu.memory_space<vmem>>, vector<2x128xi32>
    tpu.vector_store %arg4[%c0_8, %c0_9], %17 {strides = array<i32>} : memref<2x128xi32, #tpu.memory_space<vmem>>, vector<2x128xi32>,
    %c0_i32 = arith.constant 0 : i32
    %19 = vector.broadcast %c0_i32 : i32 to vector<2x128xi32>
    %20 = arith.cmpi ne, %17, %19 : vector<2x128xi32>
    %21 = arith.extui %20 : vector<2x128xi1> to vector<2x128xi8>
    %c0_10 = arith.constant 0 : index
    %c0_11 = arith.constant 0 : index
    %22 = vector.load %arg5[%c0_10, %c0_11] : memref<2x128xi8, #tpu.memory_space<vmem>>, vector<2x128xi8>
    tpu.vector_store %arg5[%c0_10, %c0_11], %21 {strides = array<i32>} : memref<2x128xi8, #tpu.memory_space<vmem>>, vector<2x128xi8>,
    return
  }
  func.func @transform_0(%arg0: i32) -> (i32, i32) {
    %c0_i32 = arith.constant 0 : i32
    %c0_i32_0 = arith.constant 0 : i32
    return %arg0, %c0_i32 : i32, i32
  }
  func.func @transform_1(%arg0: i32) -> (i32, i32) {
    %c0_i32 = arith.constant 0 : i32
    %c0_i32_0 = arith.constant 0 : i32
    %c0_i32_1 = arith.constant 0 : i32
    return %c0_i32, %c0_i32_0 : i32, i32
  }
  func.func @transform_2(%arg0: i32) -> (i32, i32) {
    %c0_i32 = arith.constant 0 : i32
    %c0_i32_0 = arith.constant 0 : i32
    %c0_i32_1 = arith.constant 0 : i32
    return %c0_i32, %c0_i32_0 : i32, i32
  }
  func.func @transform_3(%arg0: i32) -> (i32, i32) {
    %c0_i32 = arith.constant 0 : i32
    %c0_i32_0 = arith.constant 0 : i32
    return %arg0, %c0_i32 : i32, i32
  }
  func.func @transform_4(%arg0: i32) -> (i32, i32) {
    %c0_i32 = arith.constant 0 : i32
    %c0_i32_0 = arith.constant 0 : i32
    return %arg0, %c0_i32 : i32, i32
  }
}

</mosaic_0001>

<bundles_post_ra>
// kernel: tpu_custom_call.1
= control target key start
LH: loop header
LB: loop body
LE: loop exit
PB: predicated region body
PF: predicated region fallthrough
CT: control target
= control target key end

     0   :  { %10 = vsyncpa [#allocation3], 0  ;;  %vm44_vm0 = vcmask 523264   ;;  %v377_v2 = vmov 0.0|0.0   ;;  %vm378_vm2 = vmmov 0   ;;  %v379_v5 = vmov 0.0   ;;  %s522_s0 = inlined_call_operand.vmem [shape: f32[2,64], index: 0, kind: input, shape index: {}]   ;;  %s523_s1 = inlined_call_operand.vmem [shape: f32[128,64], index: 1, kind: input, shape index: {}]   ;;  %s524_s2 = inlined_call_operand.vmem [shape: f32[1,128], index: 2, kind: input, shape index: {}]   ;;  %s525_s3 = inlined_call_operand.hbm [shape: s32[2,128], index: 3, kind: output, shape index: {0}]   ;;  %s526_s4 = inlined_call_operand.hbm [shape: s8[2,128], index: 4, kind: output, shape index: {1}]  }
   0x1   :  { %v21_v0 = vld [vmem:[%s523_s1] sm:$0xff]  ;;  %v22_v1 = vld [vmem:[%s523_s1 + $0x8] sm:$0xff]  ;;  %287 = vmatprep.subr.bf16.mxu0 %v377_v2  ;;  %vm416_vm1 = vmpackc.low %vm44_vm0, %vm44_vm0  ;;  %284 = vmatprep.mubr.msk.f32.mxu0 %vm378_vm2, %v379_v5 }
   0x2   :  { %v288_v3 = vpack.c.bf16 %v22_v1, %v21_v0  ;;  %v23_v6 = vld [vmem:[%s523_s1 + $0x10] sm:$0xff]  ;;  %v24_v7 = vld [vmem:[%s523_s1 + $0x18] sm:$0xff] }
   0x4   :  { %290 = vmatpush3.bf16.xpose.msk.msra.mxu0 %vm416_vm1, %v288_v3 }
   0x5   :  { %291 = vmatprep.subr.bf16.mxu0 %v377_v2 }
   0x6   :  { %11 = vsyncpa [#allocation5], 0  ;;  %v292_v8 = vpack.c.bf16 %v24_v7, %v23_v6  ;;  %v25_v9 = vld [vmem:[%s523_s1 + $0x20] sm:$0xff]  ;;  %v26_v10 = vld [vmem:[%s523_s1 + $0x28] sm:$0xff]  ;;  %vm166_vm3 = vcmask 1041408   ;;  %vm183_vm4 = vcmask 1040384  }
   0x7   :  { %v296_v11 = vpack.c.bf16 %v26_v10, %v25_v9  ;;  %v27_v12 = vld [vmem:[%s523_s1 + $0x30] sm:$0xff]  ;;  %v28_v13 = vld [vmem:[%s523_s1 + $0x38] sm:$0xff]  ;;  %v29_v15 = vld [vmem:[%s523_s1 + $0x40] sm:$0xff]  ;;  %vm184_vm5 = vsmask.f32 256 }
   0x8   :  { %v300_v14 = vpack.c.bf16 %v28_v13, %v27_v12  ;;  %v30_v16 = vld [vmem:[%s523_s1 + $0x48] sm:$0xff]  ;;  %v31_v18 = vld [vmem:[%s523_s1 + $0x50] sm:$0xff]  ;;  %v32_v19 = vld [vmem:[%s523_s1 + $0x58] sm:$0xff] }
   0x9   :  { %v304_v17 = vpack.c.bf16 %v30_v16, %v29_v15  ;;  %v308_v20 = vpack.c.bf16 %v32_v19, %v31_v18  ;;  %v33_v21 = vld [vmem:[%s523_s1 + $0x60] sm:$0xff]  ;;  %v34_v22 = vld [vmem:[%s523_s1 + $0x68] sm:$0xff]  ;;  %v35_v24 = vld [vmem:[%s523_s1 + $0x70] sm:$0xff] }
   0xa   :  { %v312_v23 = vpack.c.bf16 %v34_v22, %v33_v21  ;;  %v36_v25 = vld [vmem:[%s523_s1 + $0x78] sm:$0xff]  ;;  %v20_v27 = vld [vmem:[%s522_s0] sm:$0x3]  ;;  %s380_s0 = smov [#allocation2]   ;;  %vm485_vm7 = vmand %vm183_vm4, %vm184_vm5 }
   0xb   :  { %v316_v26 = vpack.c.bf16 %v36_v25, %v35_v24  ;;  %v217_v28 = vld [vmem:[%s524_s2] ss:$0 sm:$0xff]  ;;  %s195_s1 = sshll.u32 %s380_s0, 4  ;;  %s381_s2 = smov [#allocation4]   ;;  %s196_s1 = int_to_ptr.vmem [resolvable:$true] %s195_s1 }
   0xc   :  { %294 = vmatpush3.bf16.xpose.msk.msra.mxu0 %vm416_vm1, %v292_v8  ;;  %s205_s25 = sshll.u32 %s381_s2, 4  ;;  %s329_s26 = scalar_lea.vmem %s196_s1, 32  ;;  %s206_s25 = int_to_ptr.vmem [resolvable:$true] %s205_s25 }
   0xd   :  { %295 = vmatprep.subr.bf16.mxu0 %v377_v2  ;;  %p330_p0 = scmp.ne.s32.totalorder %s196_s1, %s329_s26  ;;  %p334_p1 = scmp.lt.s32.totalorder %s196_s1, %s196_s1 }
   0xe   :  { %p335_p2 = scmp.lt.s32.totalorder %s329_s26, %s329_s26 }
  0x10   :  { %p336_p3 = por %p335_p2, %p334_p1 }
  0x12   :  { %p337_p4 = pnand %p336_p3, %p330_p0 }
  0x14   :  { %298 = vmatpush3.bf16.xpose.msk.msra.mxu0 %vm416_vm1, %v296_v11 }
  0x15   :  { %299 = vmatprep.subr.bf16.mxu0 %v377_v2 }
  0x1c   :  { %302 = vmatpush3.bf16.xpose.msk.msra.mxu0 %vm416_vm1, %v300_v14 }
  0x1d   :  { %303 = vmatprep.subr.bf16.mxu0 %v377_v2 }
  0x24   :  { %306 = vmatpush3.bf16.xpose.msk.msra.mxu0 %vm416_vm1, %v304_v17 }
  0x25   :  { %307 = vmatprep.subr.bf16.mxu0 %v377_v2 }
  0x2c   :  { %310 = vmatpush3.bf16.xpose.msk.msra.mxu0 %vm416_vm1, %v308_v20 }
  0x2d   :  { %311 = vmatprep.subr.bf16.mxu0 %v377_v2 }
  0x34   :  { %314 = vmatpush3.bf16.xpose.msk.msra.mxu0 %vm416_vm1, %v312_v23 }
  0x35   :  { %315 = vmatprep.subr.bf16.mxu0 %v377_v2 }
  0x3c   :  { %318 = vmatpush3.bf16.xpose.msk.msra.mxu0 %vm416_vm1, %v316_v26 }
  0x43   :  { %285 = vmatmul.mubr.msk.f32.vlgmr.msra.gmra.mrb[0].mxu0 %vm44_vm0, %v20_v27 }
 0x116   :  { %v162_v29 = vpop.f32.mrb[0].mxu0 }
 0x117   :  { %v163_v30 = vadd.f32 %v217_v28, %v162_v29  ;;  %v286_v31 = vpop.f32.mrb[1].mxu0 }
 0x119   :  { %v167_v32 = vsel %vm166_vm3, %v163_v30, inf }
 0x11a   :  { %168 = vmin.xlane.f32.xlu0 %v167_v32 }
 0x1a7   :  { %v169_v33 = vpop.xlane.xlu0 %168 }
 0x1a8   :  { %v170_v34 = vsub.f32 %v163_v30, %v169_v33 }
 0x1aa   :  { %v171_v35 = vsel %vm166_vm3, %v170_v34, -inf }
 0x1ab   :  { %172 = vmax.xlane.f32.xlu0 %v171_v35 }
 0x238   :  { %v173_v36 = vpop.xlane.xlu0 %172 }
 0x239   :  { %327 = vrcp.f32 %v173_v36 }
 0x243   :  { %v328_v37 = vpop.eup %327 }
 0x244   :  { %v175_v38 = vmul.f32 255.0, %v328_v37 }
 0x246   :  { %v176_v39 = vmul.f32 %v175_v38, %v170_v34 }
 0x248   :  { %v319_v40 = vtrunc.f32 %v176_v39 }
 0x24a   :  { %v320_v41 = vcvt.f32.s32 %v319_v40 }
 0x24c   :  { %178 = vst [vmem:[#allocation2] sm:$0x3] %v320_v41  ;;  %vm179_vm6 = vcmp.ne.s32.totalorder %v320_v41, 0 }
 0x24d   :  { %vm489_vm8 = vmpackc.low %vm179_vm6, %vm179_vm6 }
 0x24e   :  { %340 = shalt.err (!%p337_p4)
}
 0x24f   :  { %s341_s29 = scalar_lea.hbm %s525_s3, 32 }
 0x250   :  { %p342_p5 = scmp.ne.s32.totalorder %s525_s3, %s341_s29  ;;  %p345_p6 = scmp.lt.u32.totalorder %s341_s29, %s525_s3 }
 0x252   :  { %p347_p7 = pnand %p345_p6, %p342_p5 }
 0x254   :  { %350 = shalt.err (!%p347_p7)
}
 0x255   :  { %198 = dma.vmem_to_hbm [thread:$0]  %s196_s1, 32, %s525_s3, [#allocation3]   ;;  %v186_v44 = vld [vmem:[#allocation4] sm:$0x1]  ;;  %vm181_vm9 = vmpackc.even %vm489_vm8, %vm489_vm8  ;;  %v382_v45 = vmov 0  }
 0x256   :  { %v182_v46 = vsel %vm181_vm9, 16843009, %v382_v45  ;;  %s351_s10 = scalar_lea.vmem %s206_s25, 16  ;;  %s355_s11 = scalar_lea.vmem %s206_s25, 32 }
 0x257   :  { %v187_v47 = vsel %vm485_vm7, %v182_v46, %v186_v44  ;;  %p352_p8 = scmp.ne.s32.totalorder %s206_s25, %s351_s10  ;;  %p356_p9 = scmp.lt.s32.totalorder %s206_s25, %s206_s25 }
 0x258   :  { %188 = vst [vmem:[#allocation4] sm:$0x1] %v187_v47  ;;  %p357_p10 = scmp.lt.s32.totalorder %s355_s11, %s351_s10 }
 0x25a   :  { %p358_p11 = por %p357_p10, %p356_p9 }
 0x25c   :  { %p359_p12 = pnand %p358_p11, %p352_p8 }
 0x25e   :  { %362 = shalt.err (!%p359_p12)
}
 0x25f   :  { %s363_s13 = scalar_lea.hbm %s526_s4, 16 }
 0x260   :  { %p364_p13 = scmp.ne.s32.totalorder %s526_s4, %s363_s13  ;;  %p367_p0 = scmp.lt.u32.totalorder %s363_s13, %s526_s4 }
 0x262   :  { %p369_p1 = pnand %p367_p0, %p364_p13 }
 0x264   :  { %372 = shalt.err (!%p369_p1)
}
 0x265   :  { %208 = dma.vmem_to_hbm [thread:$0]  %s206_s25, 16, %s526_s4, [#allocation5]  }
 0x266   :  { %373 = dma.done.wait [#allocation3], 32  }
 0x267   :  { %374 = vsyncadd [#allocation3], 4294967264 }
 0x268   :  { %375 = dma.done.wait [#allocation5], 16  }
 0x269   :  { %376 = vsyncadd [#allocation5], 4294967280 }
 0x26a   :  { %215 = vsyncpa [#allocation3], 1 }
 0x26b   :  { %216 = vsyncpa [#allocation5], 1 }

</bundles_post_ra>
